<compile_context>
chip_gen: v7x
topology: tpu7x:2x2x1
jax: 0.10.0
libtpu: 0.0.40
codegen_flags: <defaults>
</compile_context>

<pallas_src>
import jax
import jax.numpy as jnp
from jax.experimental import pallas as pl
from jax.experimental.pallas import tpu as pltpu


def _round_up(x, m):
    return ((x + m - 1) // m) * m


def _softmax_last(x):
    # Numerically stable softmax over the last axis; divide -> EUP approx reciprocal.
    m = jnp.max(x, axis=-1, keepdims=True)
    e = jnp.exp(x - m)
    return e * pl.reciprocal(jnp.sum(e, axis=-1, keepdims=True), approx=True)


def _kels_mlp_kernel(x_ref, w1_ref, b1_ref, w2_ref, b2_ref, o_ref):
    # Layer 1: bf16 MXU matmul, f32 accumulation + f32 bias.
    h = jnp.dot(x_ref[...], w1_ref[...], preferred_element_type=jnp.float32) + b1_ref[...]
    h = _softmax_last(h)                                  # (TM, H) f32, rows sum to 1
    # Layer 2 (h is in [0,1]; bf16 cast error is negligible after the flat softmax).
    t = jnp.dot(h.astype(w2_ref.dtype), w2_ref[...],
                preferred_element_type=jnp.float32) + b2_ref[...]
    t = _softmax_last(t)                                  # (TM, T) f32 in [0, 1]
    # Final (redundant but spec-faithful) softmax.  t is already in [0, 1], so the
    # max-subtraction is safe to skip; use an exact divide here for error margin.
    e = jnp.exp(t)
    o_ref[...] = (e / jnp.sum(e, axis=-1, keepdims=True)).astype(o_ref.dtype)


def prepare_kels_mlp_params(w1, b1, w2, b2):
    """Cast / reshape parameters once (outside the per-call path).

    w1: (input_size, hidden_size), w2: (hidden_size, target_size)  -> bf16 (MXU path)
    b1: (hidden_size,), b2: (target_size,)                         -> f32 row vectors
    """
    return (jnp.asarray(w1, jnp.bfloat16),
            jnp.asarray(b1, jnp.float32).reshape(1, -1),
            jnp.asarray(w2, jnp.bfloat16),
            jnp.asarray(b2, jnp.float32).reshape(1, -1))


def _pick_tile_m(batch_padded8, d_in, t_dim, vmem_budget_bytes):
    # Largest batch tile up to 512 rows, but keep >= 2 grid tiles whenever the batch
    # allows it so the "parallel" axis can occupy both v7x TensorCores.
    tile_m = batch_padded8
    for t in (512, 256, 128, 64, 32, 16, 8):
        if batch_padded8 >= 2 * t:
            tile_m = t
            break

    # VMEM guard (only matters if input_size grows a lot): double-buffered bf16 x tile
    # plus double-buffered f32 output tile must fit well under the scoped limit.
    def tile_bytes(tm):
        return 2 * tm * d_in * 2 + 2 * tm * t_dim * 4

    while tile_m > 8 and tile_bytes(tile_m) > vmem_budget_bytes:
        tile_m //= 2
    return tile_m


def kels_mlp_forward_batched(x, params):
    """x: (B, input_size) float.  params: output of prepare_kels_mlp_params.
    Returns (B, target_size) float32."""
    w1, b1, w2, b2 = params
    x = jnp.asarray(x, jnp.float32)
    B, d_in = x.shape
    h_dim = w1.shape[1]
    t_dim = w2.shape[1]

    vmem_limit = 32 * 1024 * 1024
    bp8 = _round_up(max(B, 1), 8)
    tile_m = _pick_tile_m(bp8, d_in, t_dim, vmem_budget_bytes=vmem_limit // 2)
    bp = _round_up(B, tile_m)

    xb = x.astype(jnp.bfloat16)          # halves the dominant HBM read; MXU-native
    if bp != B:                          # pad batch rows only when actually needed
        xb = jnp.zeros((bp, d_in), jnp.bfloat16).at[:B].set(xb)

    out = pl.pallas_call(
        _kels_mlp_kernel,
        out_shape=jax.ShapeDtypeStruct((bp, t_dim), jnp.float32),
        grid=(bp // tile_m,),
        in_specs=[
            pl.BlockSpec((tile_m, d_in), lambda i: (i, 0)),   # batched activations
            pl.BlockSpec((d_in, h_dim), lambda i: (0, 0)),    # W1 resident (full dims)
            pl.BlockSpec((1, h_dim), lambda i: (0, 0)),       # b1 resident
            pl.BlockSpec((h_dim, t_dim), lambda i: (0, 0)),   # W2 resident
            pl.BlockSpec((1, t_dim), lambda i: (0, 0)),       # b2 resident
        ],
        # Output block's last dim equals the full array dim, so no lane padding and
        # the HBM writeback is exactly the useful payload (no post-slice pass needed
        # when B is a tile multiple).
        out_specs=pl.BlockSpec((tile_m, t_dim), lambda i: (i, 0)),
        compiler_params=pltpu.CompilerParams(
            dimension_semantics=("parallel",),    # shard batch tiles over v7x's 2 TCs
            vmem_limit_bytes=vmem_limit,
        ),
    )(xb, w1, b1, w2, b2)
    return out if bp == B else out[:B]


def kels_mlp_forward(inp, params):
    """Module-faithful forward: flatten the whole input to one vector, return (target_size,)."""
    v = jnp.asarray(inp, jnp.float32).reshape(1, -1)
    return kels_mlp_forward_batched(v, params)[0]


if __name__ == "__main__":
    # Small shapes consistent with the module: input (2, 4, 16) flattens to 128.
    input_size = 2 * 4 * 16      # 128
    hidden_size = 32
    target_size = hidden_size    # module forces target_size = hidden_size

    key = jax.random.PRNGKey(0)
    k_x, k_w1, k_b1, k_w2, k_b2, k_xb = jax.random.split(key, 6)

    # nn.Linear(in, out) parameters, stored pre-transposed as (in_features, out_features).
    w1 = jax.random.normal(k_w1, (input_size, hidden_size), dtype=jnp.float32) * 0.05
    b1 = jax.random.normal(k_b1, (hidden_size,), dtype=jnp.float32) * 0.05
    w2 = jax.random.normal(k_w2, (hidden_size, target_size), dtype=jnp.float32) * 0.05
    b2 = jax.random.normal(k_b2, (target_size,), dtype=jnp.float32) * 0.05

    params = prepare_kels_mlp_params(w1, b1, w2, b2)   # prepared/cast once, reused per call

    def ref_one(v):
        def sm(z):
            z = z - jnp.max(z, axis=-1, keepdims=True)
            e = jnp.exp(z)
            return e / jnp.sum(e, axis=-1, keepdims=True)
        h = sm(v @ w1 + b1)
        t = sm(h @ w2 + b2)
        return sm(t)

    # 1) Module-faithful single forward (input (2,4,16) -> flatten to 128).
    x_in = jax.random.normal(k_x, (2, 4, 16), dtype=jnp.float32)
    out1 = jax.block_until_ready(kels_mlp_forward(x_in, params))
    ref1 = ref_one(x_in.reshape(-1))
    assert out1.shape == (target_size,)
    assert jnp.allclose(out1, ref1, atol=2e-3), "single-vector mismatch vs reference"

    # 2) Batched path: B=256 -> tile_m=128, grid=(2,) so both v7x TCs get a tile.
    B = 256
    xb = jax.random.normal(k_xb, (B, input_size), dtype=jnp.float32)
    outb = jax.block_until_ready(kels_mlp_forward_batched(xb, params))
    refb = jax.vmap(ref_one)(xb)
    assert outb.shape == (B, target_size)
    assert jnp.allclose(outb, refb, atol=2e-3), "batched mismatch vs reference"

    print("KERNEL_OK")
</pallas_src>

<mosaic_0001>
module attributes {stable_mosaic.version = 11 : i64} {
  func.func @_kels_mlp_kernel(%arg0: i32, %arg1: memref<8x128xbf16, #tpu.memory_space<vmem>>, %arg2: memref<128x32xbf16, #tpu.memory_space<vmem>>, %arg3: memref<1x32xf32, #tpu.memory_space<vmem>>, %arg4: memref<32x32xbf16, #tpu.memory_space<vmem>>, %arg5: memref<1x32xf32, #tpu.memory_space<vmem>>, %arg6: memref<8x32xf32, #tpu.memory_space<vmem>>) attributes {dimension_semantics = [#tpu.dimension_semantics<parallel>], iteration_bounds = array<i64: 1>, scalar_prefetch = 0 : i64, scratch_operands = 0 : i64, tpu.core_type = #tpu.core_type<tc>, window_params = [{transform_indices = @transform_0, window_bounds = array<i64: 8, 128>}, {pipeline_mode = #tpu.pipeline_mode<synchronous>, transform_indices = @transform_1, window_bounds = array<i64: 128, 32>}, {pipeline_mode = #tpu.pipeline_mode<synchronous>, transform_indices = @transform_2, window_bounds = array<i64: 1, 32>}, {pipeline_mode = #tpu.pipeline_mode<synchronous>, transform_indices = @transform_3, window_bounds = array<i64: 32, 32>}, {pipeline_mode = #tpu.pipeline_mode<synchronous>, transform_indices = @transform_4, window_bounds = array<i64: 1, 32>}, {transform_indices = @transform_5, window_bounds = array<i64: 8, 32>}]} {
    %c0 = arith.constant 0 : index
    %c0_0 = arith.constant 0 : index
    %0 = vector.load %arg1[%c0, %c0_0] : memref<8x128xbf16, #tpu.memory_space<vmem>>, vector<8x128xbf16>
    %c0_1 = arith.constant 0 : index
    %c0_2 = arith.constant 0 : index
    %1 = vector.load %arg2[%c0_1, %c0_2] : memref<128x32xbf16, #tpu.memory_space<vmem>>, vector<128x32xbf16>
    %cst = arith.constant dense<0.000000e+00> : vector<8x32xf32>
    %2 = tpu.matmul %0, %1, %cst {dimension_numbers = #tpu.dot_dimension_numbers<[1], [0], [0], [1], [0, 0, 1, 1], [], []>} : vector<8x128xbf16>, vector<128x32xbf16>, vector<8x32xf32> -> vector<8x32xf32>
    %c0_3 = arith.constant 0 : index
    %c0_4 = arith.constant 0 : index
    %3 = vector.load %arg3[%c0_3, %c0_4] : memref<1x32xf32, #tpu.memory_space<vmem>>, vector<1x32xf32>
    %4 = vector.broadcast %3 : vector<1x32xf32> to vector<8x32xf32>
    %5 = arith.addf %2, %4 : vector<8x32xf32>
    %cst_5 = arith.constant dense<0xFF800000> : vector<8xf32>
    %6 = vector.multi_reduction <maximumf>, %5, %cst_5 [1] : vector<8x32xf32> to vector<8xf32>
    %7 = vector.shape_cast %6 : vector<8xf32> to vector<8x1xf32>
    %8 = vector.broadcast %7 : vector<8x1xf32> to vector<8x32xf32>
    %9 = arith.subf %5, %8 : vector<8x32xf32>
    %10 = math.exp %9 : vector<8x32xf32>
    %cst_6 = arith.constant dense<0.000000e+00> : vector<8xf32>
    %11 = vector.multi_reduction <add>, %10, %cst_6 [1] : vector<8x32xf32> to vector<8xf32>
    %12 = vector.shape_cast %11 : vector<8xf32> to vector<8x1xf32>
    %13 = tpu.reciprocal %12 {approx = true} : vector<8x1xf32> -> vector<8x1xf32>
    %14 = vector.broadcast %13 : vector<8x1xf32> to vector<8x32xf32>
    %15 = arith.mulf %10, %14 : vector<8x32xf32>
    %16 = arith.truncf %15 : vector<8x32xf32> to vector<8x32xbf16>
    %c0_7 = arith.constant 0 : index
    %c0_8 = arith.constant 0 : index
    %17 = vector.load %arg4[%c0_7, %c0_8] : memref<32x32xbf16, #tpu.memory_space<vmem>>, vector<32x32xbf16>
    %cst_9 = arith.constant dense<0.000000e+00> : vector<8x32xf32>
    %18 = tpu.matmul %16, %17, %cst_9 {dimension_numbers = #tpu.dot_dimension_numbers<[1], [0], [0], [1], [0, 0, 1, 1], [], []>} : vector<8x32xbf16>, vector<32x32xbf16>, vector<8x32xf32> -> vector<8x32xf32>
    %c0_10 = arith.constant 0 : index
    %c0_11 = arith.constant 0 : index
    %19 = vector.load %arg5[%c0_10, %c0_11] : memref<1x32xf32, #tpu.memory_space<vmem>>, vector<1x32xf32>
    %20 = vector.broadcast %19 : vector<1x32xf32> to vector<8x32xf32>
    %21 = arith.addf %18, %20 : vector<8x32xf32>
    %cst_12 = arith.constant dense<0xFF800000> : vector<8xf32>
    %22 = vector.multi_reduction <maximumf>, %21, %cst_12 [1] : vector<8x32xf32> to vector<8xf32>
    %23 = vector.shape_cast %22 : vector<8xf32> to vector<8x1xf32>
    %24 = vector.broadcast %23 : vector<8x1xf32> to vector<8x32xf32>
    %25 = arith.subf %21, %24 : vector<8x32xf32>
    %26 = math.exp %25 : vector<8x32xf32>
    %cst_13 = arith.constant dense<0.000000e+00> : vector<8xf32>
    %27 = vector.multi_reduction <add>, %26, %cst_13 [1] : vector<8x32xf32> to vector<8xf32>
    %28 = vector.shape_cast %27 : vector<8xf32> to vector<8x1xf32>
    %29 = tpu.reciprocal %28 {approx = true} : vector<8x1xf32> -> vector<8x1xf32>
    %30 = vector.broadcast %29 : vector<8x1xf32> to vector<8x32xf32>
    %31 = arith.mulf %26, %30 : vector<8x32xf32>
    %32 = math.exp %31 : vector<8x32xf32>
    %cst_14 = arith.constant dense<0.000000e+00> : vector<8xf32>
    %33 = vector.multi_reduction <add>, %32, %cst_14 [1] : vector<8x32xf32> to vector<8xf32>
    %34 = vector.shape_cast %33 : vector<8xf32> to vector<8x1xf32>
    %35 = vector.broadcast %34 : vector<8x1xf32> to vector<8x32xf32>
    %36 = arith.divf %32, %35 : vector<8x32xf32>
    %c0_15 = arith.constant 0 : index
    %c0_16 = arith.constant 0 : index
    %37 = vector.load %arg6[%c0_15, %c0_16] : memref<8x32xf32, #tpu.memory_space<vmem>>, vector<8x32xf32>
    tpu.vector_store %arg6[%c0_15, %c0_16], %36 {strides = array<i32>} : memref<8x32xf32, #tpu.memory_space<vmem>>, vector<8x32xf32>,
    return
  }
  func.func @transform_0(%arg0: i32) -> (i32, i32) {
    %c0_i32 = arith.constant 0 : i32
    %c0_i32_0 = arith.constant 0 : i32
    return %arg0, %c0_i32 : i32, i32
  }
  func.func @transform_1(%arg0: i32) -> (i32, i32) {
    %c0_i32 = arith.constant 0 : i32
    %c0_i32_0 = arith.constant 0 : i32
    %c0_i32_1 = arith.constant 0 : i32
    return %c0_i32, %c0_i32_0 : i32, i32
  }
  func.func @transform_2(%arg0: i32) -> (i32, i32) {
    %c0_i32 = arith.constant 0 : i32
    %c0_i32_0 = arith.constant 0 : i32
    %c0_i32_1 = arith.constant 0 : i32
    return %c0_i32, %c0_i32_0 : i32, i32
  }
  func.func @transform_3(%arg0: i32) -> (i32, i32) {
    %c0_i32 = arith.constant 0 : i32
    %c0_i32_0 = arith.constant 0 : i32
    %c0_i32_1 = arith.constant 0 : i32
    return %c0_i32, %c0_i32_0 : i32, i32
  }
  func.func @transform_4(%arg0: i32) -> (i32, i32) {
    %c0_i32 = arith.constant 0 : i32
    %c0_i32_0 = arith.constant 0 : i32
    %c0_i32_1 = arith.constant 0 : i32
    return %c0_i32, %c0_i32_0 : i32, i32
  }
  func.func @transform_5(%arg0: i32) -> (i32, i32) {
    %c0_i32 = arith.constant 0 : i32
    %c0_i32_0 = arith.constant 0 : i32
    return %arg0, %c0_i32 : i32, i32
  }
}

</mosaic_0001>

<bundles_post_ra>
// kernel: tpu_custom_call.1
= control target key start
LH: loop header
LB: loop body
LE: loop exit
PB: predicated region body
PF: predicated region fallthrough
CT: control target
= control target key end

     0   :  { %v348_v1 = vmov 0.0   ;;  %vm349_vm0 = vmmov 0   ;;  %s439_s0 = inlined_call_operand.vmem [shape: bf16[8,128], index: 0, kind: input, shape index: {}]   ;;  %s440_s1 = inlined_call_operand.vmem [shape: bf16[128,32], index: 1, kind: input, shape index: {}]   ;;  %s441_s2 = inlined_call_operand.vmem [shape: f32[1,32], index: 2, kind: input, shape index: {}]   ;;  %s442_s3 = inlined_call_operand.vmem [shape: bf16[32,32], index: 3, kind: input, shape index: {}]   ;;  %s443_s4 = inlined_call_operand.vmem [shape: f32[1,32], index: 4, kind: input, shape index: {}]   ;;  %s444_s5 = inlined_call_operand.hbm [shape: f32[8,32], index: 5, kind: output, shape index: {}]  }
   0x1   :  { %v302_v0 = vld [vmem:[%s440_s1] sm:$0xff]   ;;  %271 = vmatprep.subr.bf16.mxu0 %v348_v1  ;;  %291 = vmatprep.subr.bf16.mxu1 %v348_v1  ;;  %v303_v2 = vld [vmem:[%s440_s1 + $0x8] sm:$0xff]   ;;  %v304_v3 = vld [vmem:[%s440_s1 + $0x10] sm:$0xff]  }
   0x2   :  { %272 = vmatpush3.bf16.msra.mxu0 %v302_v0  ;;  %287 = vmatprep.mubr.msk.bf16.mxu0 %vm349_vm0, %v348_v1  ;;  %v305_v4 = vld [vmem:[%s440_s1 + $0x18] sm:$0xff]  }
   0x3   :  { %273 = vmatprep.subr.bf16.mxu0 %v348_v1  ;;  %295 = vmatprep.mubr.msk.bf16.mxu1 %vm349_vm0, %v348_v1 }
   0x6   :  { %274 = vmatpush3.bf16.msra.mxu0 %v303_v2 }
   0x7   :  { %275 = vmatprep.subr.bf16.mxu0 %v348_v1 }
   0xa   :  { %276 = vmatpush3.bf16.msra.mxu0 %v304_v3 }
   0xb   :  { %10 = vsyncpa [#allocation3], 0  ;;  %277 = vmatprep.subr.bf16.mxu0 %v348_v1  ;;  %v306_v5 = vld [vmem:[%s440_s1 + $0x20] sm:$0xff]   ;;  %v307_v6 = vld [vmem:[%s440_s1 + $0x28] sm:$0xff]   ;;  %vm134_vm1 = vcmask 261120  }
   0xc   :  { %v308_v7 = vld [vmem:[%s440_s1 + $0x30] sm:$0xff]   ;;  %v309_v8 = vld [vmem:[%s440_s1 + $0x38] sm:$0xff]   ;;  %v22_v9 = vld [vmem:[%s439_s0] sm:$0xf] }
   0xd   :  { %v246_v10 = vld [vmem:[%s441_s2] ss:$0 sm:$0xff]  ;;  %v311_v23 = vld [vmem:[%s442_s3 + $0x8] sm:$0xff]  }
   0xe   :  { %278 = vmatpush3.bf16.msra.mxu0 %v305_v4  ;;  %v310_v22 = vld [vmem:[%s442_s3] sm:$0xff]   ;;  %s350_s3 = smov [#allocation2]  }
   0xf   :  { %279 = vmatprep.subr.bf16.mxu0 %v348_v1  ;;  %292 = vmatpush3.bf16.msra.mxu1 %v310_v22  ;;  %v255_v28 = vld [vmem:[%s443_s4] ss:$0 sm:$0xff]  ;;  %s238_s4 = sshll.u32 %s350_s3, 4  ;;  %s239_s4 = int_to_ptr.vmem [resolvable:$true] %s238_s4 }
  0x10   :  { %293 = vmatprep.subr.bf16.mxu1 %v348_v1  ;;  %s324_s16 = scalar_lea.vmem %s239_s4, 128  ;;  %p329_p1 = scmp.lt.s32.totalorder %s239_s4, %s239_s4 }
  0x11   :  { %p325_p0 = scmp.ne.s32.totalorder %s239_s4, %s324_s16  ;;  %p330_p2 = scmp.lt.s32.totalorder %s324_s16, %s324_s16 }
  0x12   :  { %280 = vmatpush3.bf16.msra.mxu0 %v306_v5 }
  0x13   :  { %281 = vmatprep.subr.bf16.mxu0 %v348_v1  ;;  %294 = vmatpush3.bf16.msra.mxu1 %v311_v23  ;;  %p331_p3 = por %p330_p2, %p329_p1 }
  0x15   :  { %p332_p4 = pnand %p331_p3, %p325_p0 }
  0x16   :  { %282 = vmatpush3.bf16.msra.mxu0 %v307_v6 }
  0x17   :  { %283 = vmatprep.subr.bf16.mxu0 %v348_v1 }
  0x1a   :  { %284 = vmatpush3.bf16.msra.mxu0 %v308_v7 }
  0x1b   :  { %285 = vmatprep.subr.bf16.mxu0 %v348_v1 }
  0x1e   :  { %286 = vmatpush3.bf16.msra.mxu0 %v309_v8 }
  0x21   :  { %288 = vmatmul.mubr.bf16.vlgmr.msra.gmra.mrb[0].mxu0 %v22_v9 }
  0xf4   :  { %v128_v11 = vpop.f32.mrb[0].mxu0 }
  0xf5   :  { %v129_v12 = vadd.f32 %v246_v10, %v128_v11  ;;  %v289_v13 = vpop.f32.mrb[1].mxu0 }
  0xf6   :  { %v131_v14 = vpop.f32.mrb[2].mxu0 }
  0xf7   :  { %v290_v15 = vpop.f32.mrb[3].mxu0  ;;  %v135_v16 = vsel %vm134_vm1, %v129_v12, -inf }
  0xf8   :  { %136 = vmax.xlane.f32.xlu0 %v135_v16 }
 0x185   :  { %v137_v17 = vpop.xlane.xlu0 %136 }
 0x186   :  { %v138_v18 = vsub.f32 %v129_v12, %v137_v17 }
 0x188   :  { %v139_v19 = vmul.f32 1.442695, %v138_v18 }
 0x18a   :  { %312 = vpow2.f32 %v139_v19 }
 0x194   :  { %v313_v20 = vpop.eup %312 }
 0x195   :  { %v141_v21 = vsel %vm134_vm1, %v313_v20, 0.0 }
 0x196   :  { %142 = vadd.xlane.f32.xlu0 %v141_v21 }
 0x223   :  { %v143_v24 = vpop.xlane.xlu0 %142 }
 0x224   :  { %314 = vrcp.f32 %v143_v24 }
 0x22e   :  { %v315_v25 = vpop.eup %314 }
 0x22f   :  { %v145_v26 = vmul.f32 %v315_v25, %v313_v20 }
 0x231   :  { %v146_v27 = vpack.c.bf16 %v145_v26, %v145_v26 }
 0x233   :  { %296 = vmatmul.mubr.msk.bf16.vlgmr.msra.gmra.mrb[0].mxu1 %vm134_vm1, %v146_v27 }
 0x306   :  { %v207_v29 = vpop.f32.mrb[0].mxu1 }
 0x307   :  { %v208_v30 = vadd.f32 %v255_v28, %v207_v29  ;;  %v297_v31 = vpop.f32.mrb[1].mxu1 }
 0x308   :  { %v210_v32 = vpop.f32.mrb[2].mxu1 }
 0x309   :  { %v298_v33 = vpop.f32.mrb[3].mxu1  ;;  %v213_v34 = vsel %vm134_vm1, %v208_v30, -inf }
 0x30a   :  { %214 = vmax.xlane.f32.xlu1 %v213_v34 }
 0x397   :  { %v215_v35 = vpop.xlane.xlu1 %214 }
 0x398   :  { %v216_v36 = vsub.f32 %v208_v30, %v215_v35 }
 0x39a   :  { %v217_v37 = vmul.f32 1.442695, %v216_v36 }
 0x39c   :  { %316 = vpow2.f32 %v217_v37 }
 0x3a6   :  { %v317_v38 = vpop.eup %316 }
 0x3a7   :  { %v219_v39 = vsel %vm134_vm1, %v317_v38, 0.0 }
 0x3a8   :  { %220 = vadd.xlane.f32.xlu1 %v219_v39 }
 0x435   :  { %v221_v40 = vpop.xlane.xlu1 %220 }
 0x436   :  { %318 = vrcp.f32 %v221_v40 }
 0x440   :  { %v319_v41 = vpop.eup %318 }
 0x441   :  { %v223_v42 = vmul.f32 %v319_v41, %v317_v38 }
 0x443   :  { %v224_v43 = vmul.f32 1.442695, %v223_v42 }
 0x445   :  { %320 = vpow2.f32 %v224_v43 }
 0x44f   :  { %v321_v44 = vpop.eup %320 }
 0x450   :  { %v226_v45 = vsel %vm134_vm1, %v321_v44, 0.0 }
 0x451   :  { %227 = vadd.xlane.f32.xlu0 %v226_v45 }
 0x4de   :  { %v228_v46 = vpop.xlane.xlu0 %227 }
 0x4df   :  { %322 = vrcp.f32 %v228_v46 }
 0x4e9   :  { %v323_v47 = vpop.eup %322 }
 0x4ea   :  { %v230_v48 = vmul.f32 %v323_v47, %v321_v44 }
 0x4ec   :  { %231 = vst.msk [vmem:[#allocation2] sm:$0xff] %vm134_vm1, %v230_v48 }
 0x4ed   :  { %335 = shalt.err (!%p332_p4)
}
 0x4ee   :  { %s336_s19 = scalar_lea.hbm %s444_s5, 128 }
 0x4ef   :  { %p337_p5 = scmp.ne.s32.totalorder %s444_s5, %s336_s19  ;;  %p340_p6 = scmp.lt.u32.totalorder %s336_s19, %s444_s5 }
 0x4f1   :  { %p342_p7 = pnand %p340_p6, %p337_p5 }
 0x4f3   :  { %345 = shalt.err (!%p342_p7)
}
 0x4f4   :  { %241 = dma.vmem_to_hbm [thread:$0]  %s239_s4, 128, %s444_s5, [#allocation3]  }
 0x4f5   :  { %346 = dma.done.wait [#allocation3], 128  }
 0x4f6   :  { %347 = vsyncadd [#allocation3], 4294967168 }
 0x4f7   :  { %245 = vsyncpa [#allocation3], 1 }

</bundles_post_ra>
